<compile_context>
chip_gen: v7x
topology: tpu7x:2x2x1
jax: 0.10.0
libtpu: 0.0.40
codegen_flags: <defaults>
</compile_context>

<pallas_src>
import math

import jax
import jax.numpy as jnp
from jax.experimental import pallas as pl
from jax.experimental.pallas import tpu as pltpu

# Small, consistent configuration: inner_dim = num_heads * dim_head = input_dim.
NUM_HEADS = 4
DIM_HEAD = 8
INPUT_DIM = NUM_HEADS * DIM_HEAD  # C = 32
DROPOUT_P = 0.0                   # dropout is identity at inference


def _make_kernel(B, T, C, H, Dh):
    """Builds the kernel closure for a given (static) problem size."""

    def kernel(x_ref, wqkv_ref, wo_ref, bo_ref, o_ref):
        # x_ref    : (B*T, C)       activations, read from HBM exactly once
        # wqkv_ref : (3, H, C, Dh)  fused [Wq*scale | Wk | Wv], heads on leading dims
        # wo_ref   : (H*Dh, C)      output projection weight
        # bo_ref   : (1, C)         output projection bias
        # o_ref    : (B*T, C)       lane-contiguous 2-D output slab
        x = x_ref[...]  # (B*T, C)

        y_heads = []
        for h in range(H):  # static unroll, H = 4
            # Per-head projections: (B*T, C) x (C, Dh) GEMMs sharing the resident
            # x tile.  q/k/v and the head are selected purely by *leading-dim*
            # indices of the fused weight ref -> free views, no lane-offset
            # slicing of activations anywhere in the kernel (review item 2).
            # The dim_head**-0.5 query scale is already folded into Wq.
            q = jnp.dot(x, wqkv_ref[0, h], preferred_element_type=jnp.float32)  # (B*T, Dh)
            k = jnp.dot(x, wqkv_ref[1, h], preferred_element_type=jnp.float32)
            v = jnp.dot(x, wqkv_ref[2, h], preferred_element_type=jnp.float32)

            # (B*T, Dh) -> (B, T, Dh): leading-dim split at the sublane-tile
            # boundary (T = 8) -- a relabeling, no lane movement.
            q = q.reshape(B, T, Dh)
            k = k.reshape(B, T, Dh)
            v = v.reshape(B, T, Dh)

            # scores[b, i, j] = q[b, i, :] . k[b, j, :]  -> (B, T, T)
            s = jnp.einsum('bid,bjd->bij', q, k,
                           preferred_element_type=jnp.float32)

            # TODO(synk): mask / context_mask paths not exercised (forward is
            # called with mask=None, context_mask=None); they would be
            # jnp.where(mask, s, -finfo.max) before the softmax.

            # Numerically stable softmax over the key axis; denominator uses the
            # EUP approximate reciprocal (otherwise-idle slot, ~2^-12 rel err —
            # documented correctness note, covered by the 1e-3 tolerance).
            s = s - jnp.max(s, axis=-1, keepdims=True)
            e = jnp.exp(s)
            p = e * pl.reciprocal(jnp.sum(e, axis=-1, keepdims=True), approx=True)

            # dropout p = 0.0 -> identity.

            # Attention-weighted values: (B, T, Dh) -> flatten batch back out.
            yh = jnp.einsum('bij,bjd->bid', p, v,
                            preferred_element_type=jnp.float32)
            y_heads.append(yh.reshape(B * T, Dh))

        # The single lane relayout in the kernel (review item 3): concatenate the
        # heads to (B*T, H*Dh), then ONE output GEMM -- the head reduction rides
        # the MXU contraction dimension for free, replacing per-head partial
        # projections + a VPU add chain (and the replicated wo input is gone).
        y = jnp.concatenate(y_heads, axis=-1)                       # (B*T, H*Dh)
        out = jnp.dot(y, wo_ref[...], preferred_element_type=jnp.float32)
        out = out + bo_ref[...]                                     # (1, C) broadcast

        o_ref[...] = out.astype(o_ref.dtype)

    return kernel


def init_cross_attention_params(wq, wk, wv, wo, bo):
    """One-time weight re-layout, hoisted out of the per-call path (item 8).

    Returns:
      wqkv : (3, H, C, Dh)  fused [Wq * dim_head**-0.5 | Wk | Wv], per head
      wo   : (H*Dh, C)      output projection weight (unchanged layout)
      bo2  : (1, C)         output projection bias
    """
    C, inner = wq.shape
    H, Dh = NUM_HEADS, DIM_HEAD
    assert inner == H * Dh and wo.shape == (inner, C)
    scale = Dh ** (-0.5)

    def per_head(w):  # (C, H*Dh) -> (H, C, Dh)
        return w.reshape(C, H, Dh).transpose(1, 0, 2)

    wqkv = jnp.stack([per_head(wq * scale), per_head(wk), per_head(wv)], axis=0)
    return (wqkv.astype(jnp.float32),
            wo.astype(jnp.float32),
            bo.reshape(1, C).astype(jnp.float32))


@jax.jit
def cross_attention(x, context, wqkv, wo, bo2):
    """Pallas wrapper. `context` is accepted but (like the PyTorch forward)
    unused -- q, k, v are all built from x. The per-call path only reshapes x
    (a free view); all weight re-layout lives in init_cross_attention_params."""
    del context
    B, T, C = x.shape
    H, Dh = NUM_HEADS, DIM_HEAD
    inner = H * Dh

    x2d = x.reshape(B * T, C)  # free view; kernel reads x exactly once

    out2d = pl.pallas_call(
        _make_kernel(B, T, C, H, Dh),
        out_shape=jax.ShapeDtypeStruct((B * T, C), x.dtype),
        grid=(1,),  # whole problem in one step (per-step overhead > compute here)
        in_specs=[
            pl.BlockSpec((B * T, C), lambda i: (0, 0)),
            pl.BlockSpec((3, H, C, Dh), lambda i: (0, 0, 0, 0)),
            pl.BlockSpec((inner, C), lambda i: (0, 0)),
            pl.BlockSpec((1, C), lambda i: (0, 0)),
        ],
        out_specs=pl.BlockSpec((B * T, C), lambda i: (0, 0)),
        compiler_params=pltpu.CompilerParams(
            dimension_semantics=("arbitrary",)),
    )(x2d, wqkv, wo, bo2)

    return out2d.reshape(B, T, C)  # free view back to (B, T, C)


def reference_jax(x, wq, wk, wv, wo, bo):
    """Pure-JAX transcription of the PyTorch forward (for verification)."""
    B, T, C = x.shape
    q = x @ wq
    k = x @ wk
    v = x @ wv

    def _reshape(t):
        return t.reshape(B, T, NUM_HEADS, C // NUM_HEADS).transpose(0, 2, 1, 3)

    q = _reshape(q) * DIM_HEAD ** (-0.5)
    k = _reshape(k)
    v = _reshape(v)
    score = jnp.einsum('bhid,bhjd->bhij', q, k)
    attn = jax.nn.softmax(score, axis=-1)
    y = jnp.einsum('bhij,bhjd->bhid', attn, v)
    y = y.transpose(0, 2, 1, 3).reshape(B, T, C)
    return y @ wo + bo.reshape(1, 1, C)


if __name__ == "__main__":
    B, T, C = 2, 8, INPUT_DIM
    inner = NUM_HEADS * DIM_HEAD

    key = jax.random.PRNGKey(0)
    kx, kc, kq, kk, kv, ko, kb = jax.random.split(key, 7)

    x = jax.random.normal(kx, (B, T, C), dtype=jnp.float32)
    context = jax.random.normal(kc, (B, T, C), dtype=jnp.float32)  # unused by forward

    # Deterministic parameter init (nn.Linear-style uniform bounds).
    lim_in = 1.0 / math.sqrt(C)
    lim_inner = 1.0 / math.sqrt(inner)
    wq = jax.random.uniform(kq, (C, inner), jnp.float32, -lim_in, lim_in)
    wk = jax.random.uniform(kk, (C, inner), jnp.float32, -lim_in, lim_in)
    wv = jax.random.uniform(kv, (C, inner), jnp.float32, -lim_in, lim_in)
    wo = jax.random.uniform(ko, (inner, C), jnp.float32, -lim_inner, lim_inner)
    bo = jax.random.uniform(kb, (C,), jnp.float32, -lim_inner, lim_inner)

    # One-time parameter preparation (hoisted out of the per-call path).
    wqkv_p, wo_p, bo_p = init_cross_attention_params(wq, wk, wv, wo, bo)

    out = cross_attention(x, context, wqkv_p, wo_p, bo_p)
    out = jax.block_until_ready(out)

    ref = reference_jax(x, wq, wk, wv, wo, bo)
    assert out.shape == (B, T, C)
    # Tolerance sized for the EUP approximate reciprocal on the softmax
    # denominator (a few low-order bits); all other math is exact f32.
    assert jnp.allclose(out, ref, atol=1e-3, rtol=1e-3)

    print("KERNEL_OK")
</pallas_src>

<mosaic_0001>
module attributes {stable_mosaic.version = 11 : i64} {
  func.func @kernel(%arg0: i32, %arg1: memref<16x32xf32, #tpu.memory_space<vmem>>, %arg2: memref<3x4x32x8xf32, #tpu.memory_space<vmem>>, %arg3: memref<32x32xf32, #tpu.memory_space<vmem>>, %arg4: memref<1x32xf32, #tpu.memory_space<vmem>>, %arg5: memref<16x32xf32, #tpu.memory_space<vmem>>) attributes {dimension_semantics = [#tpu.dimension_semantics<arbitrary>], iteration_bounds = array<i64: 1>, scalar_prefetch = 0 : i64, scratch_operands = 0 : i64, tpu.core_type = #tpu.core_type<tc>, window_params = [{pipeline_mode = #tpu.pipeline_mode<synchronous>, transform_indices = @transform_0, window_bounds = array<i64: 16, 32>}, {pipeline_mode = #tpu.pipeline_mode<synchronous>, transform_indices = @transform_1, window_bounds = array<i64: 3, 4, 32, 8>}, {pipeline_mode = #tpu.pipeline_mode<synchronous>, transform_indices = @transform_2, window_bounds = array<i64: 32, 32>}, {pipeline_mode = #tpu.pipeline_mode<synchronous>, transform_indices = @transform_3, window_bounds = array<i64: 1, 32>}, {pipeline_mode = #tpu.pipeline_mode<synchronous>, transform_indices = @transform_4, window_bounds = array<i64: 16, 32>}]} {
    %c0 = arith.constant 0 : index
    %c0_0 = arith.constant 0 : index
    %0 = vector.load %arg1[%c0, %c0_0] : memref<16x32xf32, #tpu.memory_space<vmem>>, vector<16x32xf32>
    %c0_1 = arith.constant 0 : index
    %c0_2 = arith.constant 0 : index
    %c0_3 = arith.constant 0 : index
    %c0_4 = arith.constant 0 : index
    %1 = vector.load %arg2[%c0_1, %c0_2, %c0_3, %c0_4] : memref<3x4x32x8xf32, #tpu.memory_space<vmem>>, vector<1x1x32x8xf32>
    %2 = vector.shape_cast %1 : vector<1x1x32x8xf32> to vector<32x8xf32>
    %cst = arith.constant dense<0.000000e+00> : vector<16x8xf32>
    %3 = tpu.matmul %0, %2, %cst {dimension_numbers = #tpu.dot_dimension_numbers<[1], [0], [0], [1], [0, 0, 1, 1], [], []>} : vector<16x32xf32>, vector<32x8xf32>, vector<16x8xf32> -> vector<16x8xf32>
    %c1 = arith.constant 1 : index
    %c0_5 = arith.constant 0 : index
    %c0_6 = arith.constant 0 : index
    %c0_7 = arith.constant 0 : index
    %4 = vector.load %arg2[%c1, %c0_5, %c0_6, %c0_7] : memref<3x4x32x8xf32, #tpu.memory_space<vmem>>, vector<1x1x32x8xf32>
    %5 = vector.shape_cast %4 : vector<1x1x32x8xf32> to vector<32x8xf32>
    %cst_8 = arith.constant dense<0.000000e+00> : vector<16x8xf32>
    %6 = tpu.matmul %0, %5, %cst_8 {dimension_numbers = #tpu.dot_dimension_numbers<[1], [0], [0], [1], [0, 0, 1, 1], [], []>} : vector<16x32xf32>, vector<32x8xf32>, vector<16x8xf32> -> vector<16x8xf32>
    %c2 = arith.constant 2 : index
    %c0_9 = arith.constant 0 : index
    %c0_10 = arith.constant 0 : index
    %c0_11 = arith.constant 0 : index
    %7 = vector.load %arg2[%c2, %c0_9, %c0_10, %c0_11] : memref<3x4x32x8xf32, #tpu.memory_space<vmem>>, vector<1x1x32x8xf32>
    %8 = vector.shape_cast %7 : vector<1x1x32x8xf32> to vector<32x8xf32>
    %cst_12 = arith.constant dense<0.000000e+00> : vector<16x8xf32>
    %9 = tpu.matmul %0, %8, %cst_12 {dimension_numbers = #tpu.dot_dimension_numbers<[1], [0], [0], [1], [0, 0, 1, 1], [], []>} : vector<16x32xf32>, vector<32x8xf32>, vector<16x8xf32> -> vector<16x8xf32>
    %10 = vector.shape_cast %3 : vector<16x8xf32> to vector<2x8x8xf32>
    %11 = vector.shape_cast %6 : vector<16x8xf32> to vector<2x8x8xf32>
    %12 = vector.shape_cast %9 : vector<16x8xf32> to vector<2x8x8xf32>
    "tpu.trace_start"() <{level = 10 : i32, message = "bid,bjd->bij"}> : () -> ()
    %cst_13 = arith.constant dense<0.000000e+00> : vector<2x8x8xf32>
    %13 = tpu.matmul %10, %11, %cst_13 {dimension_numbers = #tpu.dot_dimension_numbers<[2], [2], [1], [1], [0, 0, 0, 1, 1, 1], [0], [0]>} : vector<2x8x8xf32>, vector<2x8x8xf32>, vector<2x8x8xf32> -> vector<2x8x8xf32>
    "tpu.trace_stop"() : () -> ()
    %cst_14 = arith.constant dense<0xFF800000> : vector<2x8xf32>
    %14 = vector.multi_reduction <maximumf>, %13, %cst_14 [2] : vector<2x8x8xf32> to vector<2x8xf32>
    %15 = vector.shape_cast %14 : vector<2x8xf32> to vector<2x8x1xf32>
    %16 = vector.broadcast %15 : vector<2x8x1xf32> to vector<2x8x8xf32>
    %17 = arith.subf %13, %16 : vector<2x8x8xf32>
    %18 = math.exp %17 : vector<2x8x8xf32>
    %cst_15 = arith.constant dense<0.000000e+00> : vector<2x8xf32>
    %19 = vector.multi_reduction <add>, %18, %cst_15 [2] : vector<2x8x8xf32> to vector<2x8xf32>
    %20 = vector.shape_cast %19 : vector<2x8xf32> to vector<2x8x1xf32>
    %21 = tpu.reciprocal %20 {approx = true} : vector<2x8x1xf32> -> vector<2x8x1xf32>
    %22 = vector.broadcast %21 : vector<2x8x1xf32> to vector<2x8x8xf32>
    %23 = arith.mulf %18, %22 : vector<2x8x8xf32>
    "tpu.trace_start"() <{level = 10 : i32, message = "bij,bjd->bid"}> : () -> ()
    %cst_16 = arith.constant dense<0.000000e+00> : vector<2x8x8xf32>
    %24 = tpu.matmul %23, %12, %cst_16 {dimension_numbers = #tpu.dot_dimension_numbers<[2], [1], [1], [2], [0, 0, 0, 1, 1, 2], [0], [0]>} : vector<2x8x8xf32>, vector<2x8x8xf32>, vector<2x8x8xf32> -> vector<2x8x8xf32>
    "tpu.trace_stop"() : () -> ()
    %25 = vector.shape_cast %24 : vector<2x8x8xf32> to vector<16x8xf32>
    %c0_17 = arith.constant 0 : index
    %c1_18 = arith.constant 1 : index
    %c0_19 = arith.constant 0 : index
    %c0_20 = arith.constant 0 : index
    %26 = vector.load %arg2[%c0_17, %c1_18, %c0_19, %c0_20] : memref<3x4x32x8xf32, #tpu.memory_space<vmem>>, vector<1x1x32x8xf32>
    %27 = vector.shape_cast %26 : vector<1x1x32x8xf32> to vector<32x8xf32>
    %cst_21 = arith.constant dense<0.000000e+00> : vector<16x8xf32>
    %28 = tpu.matmul %0, %27, %cst_21 {dimension_numbers = #tpu.dot_dimension_numbers<[1], [0], [0], [1], [0, 0, 1, 1], [], []>} : vector<16x32xf32>, vector<32x8xf32>, vector<16x8xf32> -> vector<16x8xf32>
    %c1_22 = arith.constant 1 : index
    %c1_23 = arith.constant 1 : index
    %c0_24 = arith.constant 0 : index
    %c0_25 = arith.constant 0 : index
    %29 = vector.load %arg2[%c1_22, %c1_23, %c0_24, %c0_25] : memref<3x4x32x8xf32, #tpu.memory_space<vmem>>, vector<1x1x32x8xf32>
    %30 = vector.shape_cast %29 : vector<1x1x32x8xf32> to vector<32x8xf32>
    %cst_26 = arith.constant dense<0.000000e+00> : vector<16x8xf32>
    %31 = tpu.matmul %0, %30, %cst_26 {dimension_numbers = #tpu.dot_dimension_numbers<[1], [0], [0], [1], [0, 0, 1, 1], [], []>} : vector<16x32xf32>, vector<32x8xf32>, vector<16x8xf32> -> vector<16x8xf32>
    %c2_27 = arith.constant 2 : index
    %c1_28 = arith.constant 1 : index
    %c0_29 = arith.constant 0 : index
    %c0_30 = arith.constant 0 : index
    %32 = vector.load %arg2[%c2_27, %c1_28, %c0_29, %c0_30] : memref<3x4x32x8xf32, #tpu.memory_space<vmem>>, vector<1x1x32x8xf32>
    %33 = vector.shape_cast %32 : vector<1x1x32x8xf32> to vector<32x8xf32>
    %cst_31 = arith.constant dense<0.000000e+00> : vector<16x8xf32>
    %34 = tpu.matmul %0, %33, %cst_31 {dimension_numbers = #tpu.dot_dimension_numbers<[1], [0], [0], [1], [0, 0, 1, 1], [], []>} : vector<16x32xf32>, vector<32x8xf32>, vector<16x8xf32> -> vector<16x8xf32>
    %35 = vector.shape_cast %28 : vector<16x8xf32> to vector<2x8x8xf32>
    %36 = vector.shape_cast %31 : vector<16x8xf32> to vector<2x8x8xf32>
    %37 = vector.shape_cast %34 : vector<16x8xf32> to vector<2x8x8xf32>
    "tpu.trace_start"() <{level = 10 : i32, message = "bid,bjd->bij"}> : () -> ()
    %cst_32 = arith.constant dense<0.000000e+00> : vector<2x8x8xf32>
    %38 = tpu.matmul %35, %36, %cst_32 {dimension_numbers = #tpu.dot_dimension_numbers<[2], [2], [1], [1], [0, 0, 0, 1, 1, 1], [0], [0]>} : vector<2x8x8xf32>, vector<2x8x8xf32>, vector<2x8x8xf32> -> vector<2x8x8xf32>
    "tpu.trace_stop"() : () -> ()
    %cst_33 = arith.constant dense<0xFF800000> : vector<2x8xf32>
    %39 = vector.multi_reduction <maximumf>, %38, %cst_33 [2] : vector<2x8x8xf32> to vector<2x8xf32>
    %40 = vector.shape_cast %39 : vector<2x8xf32> to vector<2x8x1xf32>
    %41 = vector.broadcast %40 : vector<2x8x1xf32> to vector<2x8x8xf32>
    %42 = arith.subf %38, %41 : vector<2x8x8xf32>
    %43 = math.exp %42 : vector<2x8x8xf32>
    %cst_34 = arith.constant dense<0.000000e+00> : vector<2x8xf32>
    %44 = vector.multi_reduction <add>, %43, %cst_34 [2] : vector<2x8x8xf32> to vector<2x8xf32>
    %45 = vector.shape_cast %44 : vector<2x8xf32> to vector<2x8x1xf32>
    %46 = tpu.reciprocal %45 {approx = true} : vector<2x8x1xf32> -> vector<2x8x1xf32>
    %47 = vector.broadcast %46 : vector<2x8x1xf32> to vector<2x8x8xf32>
    %48 = arith.mulf %43, %47 : vector<2x8x8xf32>
    "tpu.trace_start"() <{level = 10 : i32, message = "bij,bjd->bid"}> : () -> ()
    %cst_35 = arith.constant dense<0.000000e+00> : vector<2x8x8xf32>
    %49 = tpu.matmul %48, %37, %cst_35 {dimension_numbers = #tpu.dot_dimension_numbers<[2], [1], [1], [2], [0, 0, 0, 1, 1, 2], [0], [0]>} : vector<2x8x8xf32>, vector<2x8x8xf32>, vector<2x8x8xf32> -> vector<2x8x8xf32>
    "tpu.trace_stop"() : () -> ()
    %50 = vector.shape_cast %49 : vector<2x8x8xf32> to vector<16x8xf32>
    %c0_36 = arith.constant 0 : index
    %c2_37 = arith.constant 2 : index
    %c0_38 = arith.constant 0 : index
    %c0_39 = arith.constant 0 : index
    %51 = vector.load %arg2[%c0_36, %c2_37, %c0_38, %c0_39] : memref<3x4x32x8xf32, #tpu.memory_space<vmem>>, vector<1x1x32x8xf32>
    %52 = vector.shape_cast %51 : vector<1x1x32x8xf32> to vector<32x8xf32>
    %cst_40 = arith.constant dense<0.000000e+00> : vector<16x8xf32>
    %53 = tpu.matmul %0, %52, %cst_40 {dimension_numbers = #tpu.dot_dimension_numbers<[1], [0], [0], [1], [0, 0, 1, 1], [], []>} : vector<16x32xf32>, vector<32x8xf32>, vector<16x8xf32> -> vector<16x8xf32>
    %c1_41 = arith.constant 1 : index
    %c2_42 = arith.constant 2 : index
    %c0_43 = arith.constant 0 : index
    %c0_44 = arith.constant 0 : index
    %54 = vector.load %arg2[%c1_41, %c2_42, %c0_43, %c0_44] : memref<3x4x32x8xf32, #tpu.memory_space<vmem>>, vector<1x1x32x8xf32>
    %55 = vector.shape_cast %54 : vector<1x1x32x8xf32> to vector<32x8xf32>
    %cst_45 = arith.constant dense<0.000000e+00> : vector<16x8xf32>
    %56 = tpu.matmul %0, %55, %cst_45 {dimension_numbers = #tpu.dot_dimension_numbers<[1], [0], [0], [1], [0, 0, 1, 1], [], []>} : vector<16x32xf32>, vector<32x8xf32>, vector<16x8xf32> -> vector<16x8xf32>
    %c2_46 = arith.constant 2 : index
    %c2_47 = arith.constant 2 : index
    %c0_48 = arith.constant 0 : index
    %c0_49 = arith.constant 0 : index
    %57 = vector.load %arg2[%c2_46, %c2_47, %c0_48, %c0_49] : memref<3x4x32x8xf32, #tpu.memory_space<vmem>>, vector<1x1x32x8xf32>
    %58 = vector.shape_cast %57 : vector<1x1x32x8xf32> to vector<32x8xf32>
    %cst_50 = arith.constant dense<0.000000e+00> : vector<16x8xf32>
    %59 = tpu.matmul %0, %58, %cst_50 {dimension_numbers = #tpu.dot_dimension_numbers<[1], [0], [0], [1], [0, 0, 1, 1], [], []>} : vector<16x32xf32>, vector<32x8xf32>, vector<16x8xf32> -> vector<16x8xf32>
    %60 = vector.shape_cast %53 : vector<16x8xf32> to vector<2x8x8xf32>
    %61 = vector.shape_cast %56 : vector<16x8xf32> to vector<2x8x8xf32>
    %62 = vector.shape_cast %59 : vector<16x8xf32> to vector<2x8x8xf32>
    "tpu.trace_start"() <{level = 10 : i32, message = "bid,bjd->bij"}> : () -> ()
    %cst_51 = arith.constant dense<0.000000e+00> : vector<2x8x8xf32>
    %63 = tpu.matmul %60, %61, %cst_51 {dimension_numbers = #tpu.dot_dimension_numbers<[2], [2], [1], [1], [0, 0, 0, 1, 1, 1], [0], [0]>} : vector<2x8x8xf32>, vector<2x8x8xf32>, vector<2x8x8xf32> -> vector<2x8x8xf32>
    "tpu.trace_stop"() : () -> ()
    %cst_52 = arith.constant dense<0xFF800000> : vector<2x8xf32>
    %64 = vector.multi_reduction <maximumf>, %63, %cst_52 [2] : vector<2x8x8xf32> to vector<2x8xf32>
    %65 = vector.shape_cast %64 : vector<2x8xf32> to vector<2x8x1xf32>
    %66 = vector.broadcast %65 : vector<2x8x1xf32> to vector<2x8x8xf32>
    %67 = arith.subf %63, %66 : vector<2x8x8xf32>
    %68 = math.exp %67 : vector<2x8x8xf32>
    %cst_53 = arith.constant dense<0.000000e+00> : vector<2x8xf32>
    %69 = vector.multi_reduction <add>, %68, %cst_53 [2] : vector<2x8x8xf32> to vector<2x8xf32>
    %70 = vector.shape_cast %69 : vector<2x8xf32> to vector<2x8x1xf32>
    %71 = tpu.reciprocal %70 {approx = true} : vector<2x8x1xf32> -> vector<2x8x1xf32>
    %72 = vector.broadcast %71 : vector<2x8x1xf32> to vector<2x8x8xf32>
    %73 = arith.mulf %68, %72 : vector<2x8x8xf32>
    "tpu.trace_start"() <{level = 10 : i32, message = "bij,bjd->bid"}> : () -> ()
    %cst_54 = arith.constant dense<0.000000e+00> : vector<2x8x8xf32>
    %74 = tpu.matmul %73, %62, %cst_54 {dimension_numbers = #tpu.dot_dimension_numbers<[2], [1], [1], [2], [0, 0, 0, 1, 1, 2], [0], [0]>} : vector<2x8x8xf32>, vector<2x8x8xf32>, vector<2x8x8xf32> -> vector<2x8x8xf32>
    "tpu.trace_stop"() : () -> ()
    %75 = vector.shape_cast %74 : vector<2x8x8xf32> to vector<16x8xf32>
    %c0_55 = arith.constant 0 : index
    %c3 = arith.constant 3 : index
    %c0_56 = arith.constant 0 : index
    %c0_57 = arith.constant 0 : index
    %76 = vector.load %arg2[%c0_55, %c3, %c0_56, %c0_57] : memref<3x4x32x8xf32, #tpu.memory_space<vmem>>, vector<1x1x32x8xf32>
    %77 = vector.shape_cast %76 : vector<1x1x32x8xf32> to vector<32x8xf32>
    %cst_58 = arith.constant dense<0.000000e+00> : vector<16x8xf32>
    %78 = tpu.matmul %0, %77, %cst_58 {dimension_numbers = #tpu.dot_dimension_numbers<[1], [0], [0], [1], [0, 0, 1, 1], [], []>} : vector<16x32xf32>, vector<32x8xf32>, vector<16x8xf32> -> vector<16x8xf32>
    %c1_59 = arith.constant 1 : index
    %c3_60 = arith.constant 3 : index
    %c0_61 = arith.constant 0 : index
    %c0_62 = arith.constant 0 : index
    %79 = vector.load %arg2[%c1_59, %c3_60, %c0_61, %c0_62] : memref<3x4x32x8xf32, #tpu.memory_space<vmem>>, vector<1x1x32x8xf32>
    %80 = vector.shape_cast %79 : vector<1x1x32x8xf32> to vector<32x8xf32>
    %cst_63 = arith.constant dense<0.000000e+00> : vector<16x8xf32>
    %81 = tpu.matmul %0, %80, %cst_63 {dimension_numbers = #tpu.dot_dimension_numbers<[1], [0], [0], [1], [0, 0, 1, 1], [], []>} : vector<16x32xf32>, vector<32x8xf32>, vector<16x8xf32> -> vector<16x8xf32>
    %c2_64 = arith.constant 2 : index
    %c3_65 = arith.constant 3 : index
    %c0_66 = arith.constant 0 : index
    %c0_67 = arith.constant 0 : index
    %82 = vector.load %arg2[%c2_64, %c3_65, %c0_66, %c0_67] : memref<3x4x32x8xf32, #tpu.memory_space<vmem>>, vector<1x1x32x8xf32>
    %83 = vector.shape_cast %82 : vector<1x1x32x8xf32> to vector<32x8xf32>
    %cst_68 = arith.constant dense<0.000000e+00> : vector<16x8xf32>
    %84 = tpu.matmul %0, %83, %cst_68 {dimension_numbers = #tpu.dot_dimension_numbers<[1], [0], [0], [1], [0, 0, 1, 1], [], []>} : vector<16x32xf32>, vector<32x8xf32>, vector<16x8xf32> -> vector<16x8xf32>
    %85 = vector.shape_cast %78 : vector<16x8xf32> to vector<2x8x8xf32>
    %86 = vector.shape_cast %81 : vector<16x8xf32> to vector<2x8x8xf32>
    %87 = vector.shape_cast %84 : vector<16x8xf32> to vector<2x8x8xf32>
    "tpu.trace_start"() <{level = 10 : i32, message = "bid,bjd->bij"}> : () -> ()
    %cst_69 = arith.constant dense<0.000000e+00> : vector<2x8x8xf32>
    %88 = tpu.matmul %85, %86, %cst_69 {dimension_numbers = #tpu.dot_dimension_numbers<[2], [2], [1], [1], [0, 0, 0, 1, 1, 1], [0], [0]>} : vector<2x8x8xf32>, vector<2x8x8xf32>, vector<2x8x8xf32> -> vector<2x8x8xf32>
    "tpu.trace_stop"() : () -> ()
    %cst_70 = arith.constant dense<0xFF800000> : vector<2x8xf32>
    %89 = vector.multi_reduction <maximumf>, %88, %cst_70 [2] : vector<2x8x8xf32> to vector<2x8xf32>
    %90 = vector.shape_cast %89 : vector<2x8xf32> to vector<2x8x1xf32>
    %91 = vector.broadcast %90 : vector<2x8x1xf32> to vector<2x8x8xf32>
    %92 = arith.subf %88, %91 : vector<2x8x8xf32>
    %93 = math.exp %92 : vector<2x8x8xf32>
    %cst_71 = arith.constant dense<0.000000e+00> : vector<2x8xf32>
    %94 = vector.multi_reduction <add>, %93, %cst_71 [2] : vector<2x8x8xf32> to vector<2x8xf32>
    %95 = vector.shape_cast %94 : vector<2x8xf32> to vector<2x8x1xf32>
    %96 = tpu.reciprocal %95 {approx = true} : vector<2x8x1xf32> -> vector<2x8x1xf32>
    %97 = vector.broadcast %96 : vector<2x8x1xf32> to vector<2x8x8xf32>
    %98 = arith.mulf %93, %97 : vector<2x8x8xf32>
    "tpu.trace_start"() <{level = 10 : i32, message = "bij,bjd->bid"}> : () -> ()
    %cst_72 = arith.constant dense<0.000000e+00> : vector<2x8x8xf32>
    %99 = tpu.matmul %98, %87, %cst_72 {dimension_numbers = #tpu.dot_dimension_numbers<[2], [1], [1], [2], [0, 0, 0, 1, 1, 2], [0], [0]>} : vector<2x8x8xf32>, vector<2x8x8xf32>, vector<2x8x8xf32> -> vector<2x8x8xf32>
    "tpu.trace_stop"() : () -> ()
    %100 = vector.shape_cast %99 : vector<2x8x8xf32> to vector<16x8xf32>
    %101 = tpu.concatenate %25, %50, %75, %100 in 1 : vector<16x8xf32>, vector<16x8xf32>, vector<16x8xf32>, vector<16x8xf32> -> vector<16x32xf32>
    %c0_73 = arith.constant 0 : index
    %c0_74 = arith.constant 0 : index
    %102 = vector.load %arg3[%c0_73, %c0_74] : memref<32x32xf32, #tpu.memory_space<vmem>>, vector<32x32xf32>
    %cst_75 = arith.constant dense<0.000000e+00> : vector<16x32xf32>
    %103 = tpu.matmul %101, %102, %cst_75 {dimension_numbers = #tpu.dot_dimension_numbers<[1], [0], [0], [1], [0, 0, 1, 1], [], []>} : vector<16x32xf32>, vector<32x32xf32>, vector<16x32xf32> -> vector<16x32xf32>
    %c0_76 = arith.constant 0 : index
    %c0_77 = arith.constant 0 : index
    %104 = vector.load %arg4[%c0_76, %c0_77] : memref<1x32xf32, #tpu.memory_space<vmem>>, vector<1x32xf32>
    %105 = vector.broadcast %104 : vector<1x32xf32> to vector<16x32xf32>
    %106 = arith.addf %103, %105 : vector<16x32xf32>
    %c0_78 = arith.constant 0 : index
    %c0_79 = arith.constant 0 : index
    %107 = vector.load %arg5[%c0_78, %c0_79] : memref<16x32xf32, #tpu.memory_space<vmem>>, vector<16x32xf32>
    tpu.vector_store %arg5[%c0_78, %c0_79], %106 {strides = array<i32>} : memref<16x32xf32, #tpu.memory_space<vmem>>, vector<16x32xf32>,
    return
  }
  func.func @transform_0(%arg0: i32) -> (i32, i32) {
    %c0_i32 = arith.constant 0 : i32
    %c0_i32_0 = arith.constant 0 : i32
    %c0_i32_1 = arith.constant 0 : i32
    return %c0_i32, %c0_i32_0 : i32, i32
  }
  func.func @transform_1(%arg0: i32) -> (i32, i32, i32, i32) {
    %c0_i32 = arith.constant 0 : i32
    %c0_i32_0 = arith.constant 0 : i32
    %c0_i32_1 = arith.constant 0 : i32
    %c0_i32_2 = arith.constant 0 : i32
    %c0_i32_3 = arith.constant 0 : i32
    return %c0_i32, %c0_i32_0, %c0_i32_1, %c0_i32_2 : i32, i32, i32, i32
  }
  func.func @transform_2(%arg0: i32) -> (i32, i32) {
    %c0_i32 = arith.constant 0 : i32
    %c0_i32_0 = arith.constant 0 : i32
    %c0_i32_1 = arith.constant 0 : i32
    return %c0_i32, %c0_i32_0 : i32, i32
  }
  func.func @transform_3(%arg0: i32) -> (i32, i32) {
    %c0_i32 = arith.constant 0 : i32
    %c0_i32_0 = arith.constant 0 : i32
    %c0_i32_1 = arith.constant 0 : i32
    return %c0_i32, %c0_i32_0 : i32, i32
  }
  func.func @transform_4(%arg0: i32) -> (i32, i32) {
    %c0_i32 = arith.constant 0 : i32
    %c0_i32_0 = arith.constant 0 : i32
    %c0_i32_1 = arith.constant 0 : i32
    return %c0_i32, %c0_i32_0 : i32, i32
  }
}

</mosaic_0001>

<bundles_post_ra>
// kernel: cross_attention.1
= control target key start
LH: loop header
LB: loop body
LE: loop exit
PB: predicated region body
PF: predicated region fallthrough
CT: control target
= control target key end

     0   :  { %vm24_vm0 = vcmask 261120   ;;  %s3374_s0 = inlined_call_operand.vmem [shape: f32[16,32], index: 0, kind: input, shape index: {}]   ;;  %s3375_s1 = inlined_call_operand.vmem [shape: f32[3,4,32,8], index: 1, kind: input, shape index: {}]   ;;  %s3376_s2 = inlined_call_operand.vmem [shape: f32[32,32], index: 2, kind: input, shape index: {}]   ;;  %s3377_s3 = inlined_call_operand.vmem [shape: f32[1,32], index: 3, kind: input, shape index: {}]   ;;  %s3378_s4 = inlined_call_operand.hbm [shape: f32[16,32], index: 4, kind: output, shape index: {}]  }
   0x1   :  { %v2411_v0 = vld [vmem:[%s3375_s1 + $0x80] sm:$0xff]  ;;  %v2412_v1 = vld [vmem:[%s3375_s1 + $0x88] sm:$0xff]  ;;  %v2413_v5 = vld [vmem:[%s3375_s1 + $0x90] sm:$0xff] }
   0x2   :  { %v20_v2 = vld [vmem:[%s3375_s1] sm:$0xff]  ;;  %v2845_v3 = vpack.c.bf16 %v2412_v1, %v2411_v0  ;;  %v21_v4 = vld [vmem:[%s3375_s1 + $0x8] sm:$0xff]  ;;  %v2414_v6 = vld [vmem:[%s3375_s1 + $0x98] sm:$0xff] }
   0x3   :  { %v2837_v7 = vpack.c.bf16 %v21_v4, %v20_v2  ;;  %v2849_v8 = vpack.c.bf16 %v2414_v6, %v2413_v5  ;;  %v22_v9 = vld [vmem:[%s3375_s1 + $0x10] sm:$0xff]  ;;  %v23_v10 = vld [vmem:[%s3375_s1 + $0x18] sm:$0xff]  ;;  %v3063_v11 = vld [vmem:[%s3374_s0] sm:$0xff] }
   0x4   :  { %2846 = vmatprep.subr.bf16.mxu1 %v2845_v3  ;;  %v2841_v12 = vpack.c.bf16 %v23_v10, %v22_v9  ;;  %2633 = vmatprep.mubr.msk.f32.mxu1 %vm24_vm0, %v3063_v11 }
   0x5   :  { %9 = vsyncpa [#allocation3], 0  ;;  %2848 = vmatpush3.bf16.msra.mxu1 %v2845_v3  ;;  %2838 = vmatprep.subr.bf16.mxu0 %v2837_v7  ;;  %v3072_v13 = vld [vmem:[%s3374_s0 + $0x8] sm:$0xff]  ;;  %v3004_v14 = vmov 0.0   ;;  %vm3005_vm1 = vmmov 0   ;;  %vm266_vm2 = vcmask 64512  }
   0x6   :  { %2840 = vmatpush3.bf16.msra.mxu0 %v2837_v7  ;;  %2850 = vmatprep.subr.bf16.mxu1 %v2849_v8  ;;  %v2417_v19 = vld [vmem:[%s3375_s1 + $0x100] sm:$0xff]  ;;  %v2418_v20 = vld [vmem:[%s3375_s1 + $0x108] sm:$0xff]  ;;  %v2419_v21 = vld [vmem:[%s3375_s1 + $0x110] sm:$0xff]  ;;  %s3007_s8 = smov 16   ;;  %s3008_s16 = smov 24   ;;  %vm2293_vm3 = vcmask 130048  }
   0x7   :  { %2842 = vmatprep.subr.bf16.mxu0 %v2841_v12  ;;  %2622 = vmatprep.mubr.msk.f32.mxu0 %vm24_vm0, %v3063_v11  ;;  %v2853_v22 = vpack.c.bf16 %v2418_v20, %v2417_v19  ;;  %v2420_v23 = vld [vmem:[%s3375_s1 + $0x118] sm:$0xff]  ;;  %v2429_v43 = vld [vmem:[%s3375_s1 + $0x20] sm:$0xff]  ;;  %v2430_v44 = vld [vmem:[%s3375_s1 + $0x28] sm:$0xff]  ;;  %vm2296_vm4 = vcmask 195584   ;;  %s3009_s18 = smov [#allocation2]  }
   0x8   :  { %v2857_v24 = vpack.c.bf16 %v2420_v23, %v2419_v21  ;;  %v2861_v45 = vpack.c.bf16 %v2430_v44, %v2429_v43  ;;  %v2431_v46 = vld [vmem:[%s3375_s1 + $0x30] sm:$0xff]  ;;  %v2432_v47 = vld [vmem:[%s3375_s1 + $0x38] sm:$0xff]  ;;  %v2435_v51 = vld [vmem:[%s3375_s1 + $0xa0] sm:$0xff]  ;;  %s2398_s19 = sshll.u32 %s3009_s18, 4  ;;  %s2399_s19 = int_to_ptr.vmem [resolvable:$true] %s2398_s19 }
   0x9   :  { %2852 = vmatpush3.bf16.msra.mxu1 %v2849_v8  ;;  %v2865_v48 = vpack.c.bf16 %v2432_v47, %v2431_v46  ;;  %v2436_v52 = vld [vmem:[%s3375_s1 + $0xa8] sm:$0xff]  ;;  %v2437_v56 = vld [vmem:[%s3375_s1 + $0xb0] sm:$0xff]  ;;  %v2438_v57 = vld [vmem:[%s3375_s1 + $0xb8] sm:$0xff]  ;;  %s2980_s20 = scalar_lea.vmem %s2399_s19, 256  ;;  %p2985_p1 = scmp.lt.s32.totalorder %s2399_s19, %s2399_s19 }
   0xa   :  { %2844 = vmatpush3.bf16.msra.mxu0 %v2841_v12  ;;  %2647 = vmatprep.subr.mxu1 %v3004_v14  ;;  %v2869_v55 = vpack.c.bf16 %v2436_v52, %v2435_v51  ;;  %v2873_v60 = vpack.c.bf16 %v2438_v57, %v2437_v56  ;;  %v2441_v5 = vld [vmem:[%s3375_s1 + $0x120] sm:$0xff]  ;;  %v2442_v6 = vld [vmem:[%s3375_s1 + $0x128] sm:$0xff]  ;;  %v2443_v7 = vld [vmem:[%s3375_s1 + $0x130] sm:$0xff]  ;;  %p2981_p0 = scmp.ne.s32.totalorder %s2399_s19, %s2980_s20  ;;  %p2986_p2 = scmp.lt.s32.totalorder %s2980_s20, %s2980_s20 }
   0xb   :  { %2854 = vmatprep.subr.bf16.mxu0 %v2853_v22  ;;  %v2877_v8 = vpack.c.bf16 %v2442_v6, %v2441_v5  ;;  %v2444_v9 = vld [vmem:[%s3375_s1 + $0x138] sm:$0xff] }
   0xc   :  { %2634 = vmatmul.mubr.msk.f32.vlgmr.msra.gmra.mrb[0].mxu1 %vm24_vm0, %v3072_v13  ;;  %v2881_v10 = vpack.c.bf16 %v2444_v9, %v2443_v7  ;;  %v2462_v46 = vld [vmem:[%s3375_s1 + $0xd8] sm:$0xff]  ;;  %p2987_p3 = por %p2986_p2, %p2985_p1 }
   0xd   :  { %2623 = vmatmul.mubr.msk.f32.vlgmr.msra.gmra.mrb[0].mxu0 %vm24_vm0, %v3072_v13  ;;  %2649 = vmatprep.mubr.msk.f32.mxu1 %vm3005_vm1, %v3004_v14 }
   0xe   :  { %2644 = vmatprep.mubr.msk.f32.mxu0 %vm24_vm0, %v3063_v11  ;;  %2856 = vmatpush3.bf16.msra.mxu0 %v2853_v22  ;;  %p2988_p4 = pnand %p2987_p3, %p2981_p0 }
   0xf   :  { %2858 = vmatprep.subr.bf16.mxu0 %v2857_v24 }
  0x12   :  { %2860 = vmatpush3.bf16.msra.mxu0 %v2857_v24 }
  0x13   :  { %2862 = vmatprep.subr.bf16.mxu0 %v2861_v45 }
  0x15   :  { %2645 = vmatmul.mubr.msk.f32.vlgmr.msra.gmra.mrb[2].mxu0 %vm24_vm0, %v3072_v13 }
  0x16   :  { %2675 = vmatprep.mubr.msk.f32.mxu0 %vm24_vm0, %v3063_v11  ;;  %2864 = vmatpush3.bf16.msra.mxu0 %v2861_v45  ;;  %v2461_v45 = vld [vmem:[%s3375_s1 + $0xd0] sm:$0xff] }
  0x17   :  { %2866 = vmatprep.subr.bf16.mxu0 %v2865_v48 }
  0x1a   :  { %2868 = vmatpush3.bf16.msra.mxu0 %v2865_v48 }
  0x1b   :  { %2878 = vmatprep.subr.bf16.mxu0 %v2877_v8 }
  0x1d   :  { %2676 = vmatmul.mubr.msk.f32.vlgmr.msra.gmra.mrb[4].mxu0 %vm24_vm0, %v3072_v13 }
  0x1e   :  { %2697 = vmatprep.mubr.msk.f32.mxu0 %vm24_vm0, %v3063_v11  ;;  %2880 = vmatpush3.bf16.msra.mxu0 %v2877_v8 }
  0x1f   :  { %2882 = vmatprep.subr.bf16.mxu0 %v2881_v10 }
  0x22   :  { %2884 = vmatpush3.bf16.msra.mxu0 %v2881_v10 }
  0x23   :  { %2710 = vmatprep.subr.mxu0 %v3004_v14 }
  0x25   :  { %2698 = vmatmul.mubr.msk.f32.vlgmr.msra.gmra.mrb[6].mxu0 %vm24_vm0, %v3072_v13 }
  0x26   :  { %2712 = vmatprep.mubr.msk.f32.mxu0 %vm3005_vm1, %v3004_v14 }
  0xdf   :  { %v2635_v15 = vpop.f32.mrb[0].mxu1 }
  0xe0   :  { %v177_v16 = vpop.f32.mrb[1].mxu1  ;;  %v2624_v17 = vpop.f32.mrb[0].mxu0 }
  0xe1   :  { %2648 = vmatpush3.xpose.msk.msra.mxu1 %vm266_vm2, %v177_v16  ;;  %v97_v18 = vpop.f32.mrb[1].mxu0 }
  0xe2   :  { %2652 = vmatprep.subr.mxu1 %v3004_v14 }
  0xe4   :  { %2650 = vmatmul.mubr.msk.f32.vlgmr.msra.gmra.mrb[2].mxu1 %vm266_vm2, %v97_v18 }
  0xe5   :  { %2653 = vmatpush3.xpose.msk.msra.mxu1 %vm266_vm2, %v2635_v15  ;;  %2654 = vmatprep.mubr.msk.f32.mxu1 %vm3005_vm1, %v3004_v14 }
  0xe6   :  { %2657 = vmatprep.subr.mxu1 %v3004_v14 }
  0xe8   :  { %2655 = vmatmul.mubr.msk.f32.vlgmr.msra.gmra.mrb[4].mxu1 %vm266_vm2, %v2624_v17  ;;  %v2646_v41 = vpop.f32.mrb[2].mxu0 }
  0xe9   :  { %2659 = vmatprep.mubr.msk.f32.mxu1 %vm3005_vm1, %v3004_v14  ;;  %v257_v42 = vpop.f32.mrb[3].mxu0 }
  0xea   :  { %2658 = vmatpush3.msra.mxu1 %v257_v42 }
  0xeb   :  { %2662 = vmatprep.subr.mxu1 %v3004_v14 }
  0xf0   :  { %v2677_v61 = vpop.f32.mrb[4].mxu0 }
  0xf1   :  { %v658_v62 = vpop.f32.mrb[5].mxu0 }
 0x1b7   :  { %v339_v25 = vpop.f32.mrb[2].mxu1 }
 0x1b8   :  { %v2651_v26 = vpop.f32.mrb[3].mxu1  ;;  %v419_v27 = vsel %vm266_vm2, %v339_v25, -inf }
 0x1b9   :  { %420 = vmax.xlane.f32.xlu0 %v419_v27 }
 0x1bb   :  { %v415_v28 = vpop.f32.mrb[4].mxu1 }
 0x1bc   :  { %v2656_v29 = vpop.f32.mrb[5].mxu1  ;;  %v422_v30 = vsel %vm266_vm2, %v415_v28, -inf }
 0x1bd   :  { %423 = vmax.xlane.f32.xlu0 %v422_v30  ;;  %v2699_v30 = vpop.f32.mrb[6].mxu0 }
 0x246   :  { %v421_v31 = vpop.xlane.xlu0 %420 }
 0x247   :  { %v425_v32 = vsub.f32 %v339_v25, %v421_v31  ;;  %v818_v31 = vpop.f32.mrb[7].mxu0 }
 0x248   :  { %2711 = vmatpush3.msra.mxu0 %v818_v31  ;;  %v2479_v31 = vld [vmem:[%s3375_s1 + $0x70] sm:$0xff] }
 0x249   :  { %v427_v33 = vmul.f32 1.442695, %v425_v32  ;;  %v2459_v32 = vld [vmem:[%s3375_s1 + $0xc0] sm:$0xff] }
 0x24a   :  { %v424_v34 = vpop.xlane.xlu0 %423 }
 0x24b   :  { %2948 = vpow2.f32 %v427_v33  ;;  %v426_v35 = vsub.f32 %v415_v28, %v424_v34  ;;  %v2460_v33 = vld [vmem:[%s3375_s1 + $0xc8] sm:$0xff] }
 0x24c   :  { %v2893_v34 = vpack.c.bf16 %v2460_v33, %v2459_v32  ;;  %v2480_v32 = vld [vmem:[%s3375_s1 + $0x78] sm:$0xff] }
 0x24d   :  { %v429_v36 = vmul.f32 1.442695, %v426_v35  ;;  %v2453_v35 = vld [vmem:[%s3375_s1 + $0x40] sm:$0xff] }
 0x24f   :  { %2950 = vpow2.f32 %v429_v36  ;;  %v2454_v36 = vld [vmem:[%s3375_s1 + $0x48] sm:$0xff] }
 0x255   :  { %v2949_v37 = vpop.eup %2948 }
 0x256   :  { %v431_v38 = vsel %vm266_vm2, %v2949_v37, 0.0 }
 0x257   :  { %432 = vadd.xlane.f32.xlu1 %v431_v38 }
 0x259   :  { %v2951_v39 = vpop.eup %2950 }
 0x25a   :  { %v434_v40 = vsel %vm266_vm2, %v2951_v39, 0.0 }
 0x25b   :  { %435 = vadd.xlane.f32.xlu1 %v434_v40  ;;  %v2455_v40 = vld [vmem:[%s3375_s1 + $0x50] sm:$0xff] }
 0x2e4   :  { %v433_v49 = vpop.xlane.xlu1 %432 }
 0x2e5   :  { %2952 = vrcp.f32 %v433_v49  ;;  %v2897_v49 = vpack.c.bf16 %v2462_v46, %v2461_v45 }
 0x2e8   :  { %v436_v50 = vpop.xlane.xlu1 %435 }
 0x2e9   :  { %2954 = vrcp.f32 %v436_v50 }
 0x2ef   :  { %v2953_v53 = vpop.eup %2952 }
 0x2f0   :  { %v439_v54 = vmul.f32 %v2953_v53, %v2949_v37  ;;  %v2885_v37 = vpack.c.bf16 %v2454_v36, %v2453_v35  ;;  %v2913_v35 = vpack.c.bf16 %v2480_v32, %v2479_v31  ;;  %v2485_v36 = vld [vmem:[%s3375_s1 + $0xf0] sm:$0xff] }
 0x2f2   :  { %2660 = vmatmul.mubr.msk.f32.vlgmr.msra.gmra.mrb[6].mxu1 %vm266_vm2, %v439_v54  ;;  %2886 = vmatprep.subr.bf16.mxu0 %v2885_v37 }
 0x2f3   :  { %v2955_v58 = vpop.eup %2954  ;;  %2663 = vmatpush3.msra.mxu1 %v2646_v41  ;;  %2664 = vmatprep.mubr.msk.f32.mxu1 %vm3005_vm1, %v3004_v14  ;;  %v2456_v41 = vld [vmem:[%s3375_s1 + $0x58] sm:$0xff] }
 0x2f4   :  { %v440_v59 = vmul.f32 %v2955_v58, %v2951_v39  ;;  %2870 = vmatprep.subr.bf16.mxu1 %v2869_v55  ;;  %v2889_v44 = vpack.c.bf16 %v2456_v41, %v2455_v40  ;;  %v2465_v58 = vld [vmem:[%s3375_s1 + $0x140] sm:$0xff] }
 0x2f6   :  { %2665 = vmatmul.mubr.msk.f32.vlgmr.msra.gmra.mrb[8].mxu1 %vm266_vm2, %v440_v59  ;;  %v2466_v59 = vld [vmem:[%s3375_s1 + $0x148] sm:$0xff] }
 0x2f7   :  { %2872 = vmatpush3.bf16.msra.mxu1 %v2869_v55  ;;  %2686 = vmatprep.mubr.msk.f32.mxu1 %vm24_vm0, %v3063_v11 }
 0x2f8   :  { %2874 = vmatprep.subr.bf16.mxu1 %v2873_v60 }
 0x2fb   :  { %2876 = vmatpush3.bf16.msra.mxu1 %v2873_v60  ;;  %v2467_v60 = vld [vmem:[%s3375_s1 + $0x150] sm:$0xff] }
 0x2fc   :  { %2700 = vmatprep.subr.mxu1 %v3004_v14 }
 0x2fe   :  { %2687 = vmatmul.mubr.msk.f32.vlgmr.msra.gmra.mrb[10].mxu1 %vm24_vm0, %v3072_v13 }
 0x2ff   :  { %2702 = vmatprep.mubr.msk.f32.mxu1 %vm3005_vm1, %v3004_v14 }
 0x3c5   :  { %v3153_v63 = vpop.f32.mrb[6].mxu1 }
 0x3c6   :  { %v2661_v0 = vpop.f32.mrb[7].mxu1 }
 0x3c9   :  { %v3155_v1 = vpop.f32.mrb[8].mxu1 }
 0x3ca   :  { %v2666_v2 = vpop.f32.mrb[9].mxu1 }
 0x3d1   :  { %v2688_v3 = vpop.f32.mrb[10].mxu1 }
 0x3d2   :  { %v738_v4 = vpop.f32.mrb[11].mxu1 }
 0x3d3   :  { %2701 = vmatpush3.xpose.msk.msra.mxu1 %vm266_vm2, %v738_v4 }
 0x3d4   :  { %2705 = vmatprep.subr.mxu1 %v3004_v14 }
 0x3d6   :  { %2703 = vmatmul.mubr.msk.f32.vlgmr.msra.gmra.mrb[12].mxu1 %vm266_vm2, %v658_v62  ;;  %v2468_v62 = vld [vmem:[%s3375_s1 + $0x158] sm:$0xff] }
 0x3d7   :  { %2706 = vmatpush3.xpose.msk.msra.mxu1 %vm266_vm2, %v2688_v3  ;;  %2707 = vmatprep.mubr.msk.f32.mxu1 %vm3005_vm1, %v3004_v14  ;;  %v2905_v0 = vpack.c.bf16 %v2468_v62, %v2467_v60 }
 0x3d8   :  { %2715 = vmatprep.subr.mxu1 %v3004_v14 }
 0x3da   :  { %2708 = vmatmul.mubr.msk.f32.vlgmr.msra.gmra.mrb[14].mxu1 %vm266_vm2, %v2677_v61  ;;  %v2901_v61 = vpack.c.bf16 %v2466_v59, %v2465_v58 }
 0x3db   :  { %2717 = vmatprep.mubr.msk.f32.mxu1 %vm3005_vm1, %v3004_v14  ;;  %2716 = vmatpush3.msra.mxu1 %v2699_v30 }
 0x3dc   :  { %2894 = vmatprep.subr.bf16.mxu1 %v2893_v34 }
 0x4a9   :  { %v899_v12 = vpop.f32.mrb[12].mxu1 }
 0x4aa   :  { %v2704_v15 = vpop.f32.mrb[13].mxu1  ;;  %v979_v16 = vsel %vm266_vm2, %v899_v12, -inf }
 0x4ab   :  { %980 = vmax.xlane.f32.xlu1 %v979_v16 }
 0x4ad   :  { %v975_v17 = vpop.f32.mrb[14].mxu1 }
 0x4ae   :  { %v2709_v18 = vpop.f32.mrb[15].mxu1  ;;  %v982_v19 = vsel %vm266_vm2, %v975_v17, -inf }
 0x4af   :  { %983 = vmax.xlane.f32.xlu0 %v982_v19 }
 0x538   :  { %v981_v20 = vpop.xlane.xlu1 %980 }
 0x539   :  { %v985_v21 = vsub.f32 %v899_v12, %v981_v20 }
 0x53b   :  { %v987_v22 = vmul.f32 1.442695, %v985_v21 }
 0x53c   :  { %v984_v23 = vpop.xlane.xlu0 %983 }
 0x53d   :  { %2956 = vpow2.f32 %v987_v22  ;;  %v986_v24 = vsub.f32 %v975_v17, %v984_v23  ;;  %v2483_v23 = vld [vmem:[%s3375_s1 + $0xe0] sm:$0xff] }
 0x53f   :  { %v989_v25 = vmul.f32 1.442695, %v986_v24  ;;  %v2484_v24 = vld [vmem:[%s3375_s1 + $0xe8] sm:$0xff] }
 0x541   :  { %2958 = vpow2.f32 %v989_v25  ;;  %v2917_v25 = vpack.c.bf16 %v2484_v24, %v2483_v23 }
 0x547   :  { %v2957_v26 = vpop.eup %2956 }
 0x548   :  { %v991_v27 = vsel %vm266_vm2, %v2957_v26, 0.0 }
 0x549   :  { %992 = vadd.xlane.f32.xlu1 %v991_v27  ;;  %v2478_v27 = vld [vmem:[%s3375_s1 + $0x68] sm:$0xff] }
 0x54b   :  { %v2959_v28 = vpop.eup %2958 }
 0x54c   :  { %v994_v29 = vsel %vm266_vm2, %v2959_v28, 0.0 }
 0x54d   :  { %995 = vadd.xlane.f32.xlu0 %v994_v29 }
 0x5d6   :  { %v993_v38 = vpop.xlane.xlu1 %992 }
 0x5d7   :  { %2960 = vrcp.f32 %v993_v38 }
 0x5da   :  { %v996_v39 = vpop.xlane.xlu0 %995 }
 0x5db   :  { %2962 = vrcp.f32 %v996_v39 }
 0x5e1   :  { %v2961_v42 = vpop.eup %2960 }
 0x5e2   :  { %v999_v43 = vmul.f32 %v2961_v42, %v2957_v26  ;;  %v2477_v26 = vld [vmem:[%s3375_s1 + $0x60] sm:$0xff] }
 0x5e4   :  { %2713 = vmatmul.mubr.msk.f32.vlgmr.msra.gmra.mrb[8].mxu0 %vm266_vm2, %v999_v43 }
 0x5e5   :  { %v2963_v47 = vpop.eup %2962  ;;  %2888 = vmatpush3.bf16.msra.mxu0 %v2885_v37  ;;  %2728 = vmatprep.mubr.msk.f32.mxu0 %vm24_vm0, %v3063_v11  ;;  %v2486_v37 = vld [vmem:[%s3375_s1 + $0xf8] sm:$0xff] }
 0x5e6   :  { %v1000_v48 = vmul.f32 %v2963_v47, %v2959_v28  ;;  %2890 = vmatprep.subr.bf16.mxu0 %v2889_v44  ;;  %v2909_v28 = vpack.c.bf16 %v2478_v27, %v2477_v26  ;;  %v2921_v40 = vpack.c.bf16 %v2486_v37, %v2485_v36 }
 0x5e8   :  { %2718 = vmatmul.mubr.msk.f32.vlgmr.msra.gmra.mrb[16].mxu1 %vm266_vm2, %v1000_v48 }
 0x5e9   :  { %2896 = vmatpush3.bf16.msra.mxu1 %v2893_v34  ;;  %2892 = vmatpush3.bf16.msra.mxu0 %v2889_v44 }
 0x5ea   :  { %2898 = vmatprep.subr.bf16.mxu1 %v2897_v49  ;;  %2739 = vmatprep.mubr.msk.f32.mxu1 %vm24_vm0, %v3063_v11 }
 0x5eb   :  { %2902 = vmatprep.subr.bf16.mxu0 %v2901_v61 }
 0x5ec   :  { %2729 = vmatmul.mubr.msk.f32.vlgmr.msra.gmra.mrb[10].mxu0 %vm24_vm0, %v3072_v13 }
 0x5ed   :  { %2900 = vmatpush3.bf16.msra.mxu1 %v2897_v49  ;;  %2750 = vmatprep.mubr.msk.f32.mxu0 %vm24_vm0, %v3063_v11  ;;  %v2490_v49 = vld [vmem:[%s3375_s1 + $0x168] sm:$0xff] }
 0x5ee   :  { %2753 = vmatprep.subr.mxu1 %v3004_v14  ;;  %2904 = vmatpush3.bf16.msra.mxu0 %v2901_v61 }
 0x5ef   :  { %2906 = vmatprep.subr.bf16.mxu0 %v2905_v0 }
 0x5f0   :  { %2740 = vmatmul.mubr.msk.f32.vlgmr.msra.gmra.mrb[18].mxu1 %vm24_vm0, %v3072_v13 }
 0x5f1   :  { %2755 = vmatprep.mubr.msk.f32.mxu1 %vm3005_vm1, %v3004_v14 }
 0x5f2   :  { %2908 = vmatpush3.bf16.msra.mxu0 %v2905_v0 }
 0x5f3   :  { %2763 = vmatprep.subr.mxu0 %v3004_v14 }
 0x5f5   :  { %2751 = vmatmul.mubr.msk.f32.vlgmr.msra.gmra.mrb[12].mxu0 %vm24_vm0, %v3072_v13 }
 0x5f6   :  { %2765 = vmatprep.mubr.msk.f32.mxu0 %vm3005_vm1, %v3004_v14 }
 0x6b7   :  { %v3227_v50 = vpop.f32.mrb[8].mxu0 }
 0x6b8   :  { %v2714_v51 = vpop.f32.mrb[9].mxu0 }
 0x6b9   :  { %v2491_v51 = vld [vmem:[%s3375_s1 + $0x170] sm:$0xff] }
 0x6bb   :  { %v3229_v52 = vpop.f32.mrb[16].mxu1 }
 0x6bc   :  { %v2719_v53 = vpop.f32.mrb[17].mxu1 }
 0x6bf   :  { %v2730_v54 = vpop.f32.mrb[10].mxu0 }
 0x6c0   :  { %v1218_v55 = vpop.f32.mrb[11].mxu0 }
 0x6c3   :  { %v2741_v56 = vpop.f32.mrb[18].mxu1 }
 0x6c4   :  { %v1298_v57 = vpop.f32.mrb[19].mxu1 }
 0x6c5   :  { %2754 = vmatpush3.xpose.msk.msra.mxu1 %vm266_vm2, %v1298_v57 }
 0x6c6   :  { %2758 = vmatprep.subr.mxu1 %v3004_v14 }
 0x6c8   :  { %2756 = vmatmul.mubr.msk.f32.vlgmr.msra.gmra.mrb[20].mxu1 %vm266_vm2, %v1218_v55  ;;  %v2752_v21 = vpop.f32.mrb[12].mxu0 }
 0x6c9   :  { %2759 = vmatpush3.xpose.msk.msra.mxu1 %vm266_vm2, %v2741_v56  ;;  %2760 = vmatprep.mubr.msk.f32.mxu1 %vm3005_vm1, %v3004_v14  ;;  %v1378_v22 = vpop.f32.mrb[13].mxu0 }
 0x6ca   :  { %2768 = vmatprep.subr.mxu1 %v3004_v14  ;;  %2764 = vmatpush3.msra.mxu0 %v1378_v22 }
 0x6cb   :  { %2910 = vmatprep.subr.bf16.mxu0 %v2909_v28 }
 0x6cc   :  { %2761 = vmatmul.mubr.msk.f32.vlgmr.msra.gmra.mrb[22].mxu1 %vm266_vm2, %v2730_v54  ;;  %v2492_v54 = vld [vmem:[%s3375_s1 + $0x178] sm:$0xff] }
 0x6cd   :  { %2770 = vmatprep.mubr.msk.f32.mxu1 %vm3005_vm1, %v3004_v14  ;;  %2769 = vmatpush3.msra.mxu1 %v2752_v21  ;;  %v2929_v55 = vpack.c.bf16 %v2492_v54, %v2491_v51  ;;  %v2302_v21 = vld [vmem:[%s3376_s2 + $0x18] sm:$0xff] }
 0x6ce   :  { %2918 = vmatprep.subr.bf16.mxu1 %v2917_v25 }
 0x79b   :  { %v1459_v2 = vpop.f32.mrb[20].mxu1 }
 0x79c   :  { %v2757_v3 = vpop.f32.mrb[21].mxu1  ;;  %v1539_v4 = vsel %vm266_vm2, %v1459_v2, -inf }
 0x79d   :  { %1540 = vmax.xlane.f32.xlu1 %v1539_v4 }
 0x79f   :  { %v1535_v5 = vpop.f32.mrb[22].mxu1 }
 0x7a0   :  { %v2762_v6 = vpop.f32.mrb[23].mxu1  ;;  %v1542_v7 = vsel %vm266_vm2, %v1535_v5, -inf }
 0x7a1   :  { %1543 = vmax.xlane.f32.xlu0 %v1542_v7 }
 0x82a   :  { %v1541_v8 = vpop.xlane.xlu1 %1540 }
 0x82b   :  { %v1545_v9 = vsub.f32 %v1459_v2, %v1541_v8 }
 0x82d   :  { %v1547_v10 = vmul.f32 1.442695, %v1545_v9 }
 0x82e   :  { %v1544_v12 = vpop.xlane.xlu0 %1543 }
 0x82f   :  { %2964 = vpow2.f32 %v1547_v10  ;;  %v1546_v15 = vsub.f32 %v1535_v5, %v1544_v12 }
 0x831   :  { %v1549_v16 = vmul.f32 1.442695, %v1546_v15 }
 0x833   :  { %2966 = vpow2.f32 %v1549_v16 }
 0x839   :  { %v2965_v17 = vpop.eup %2964 }
 0x83a   :  { %v1551_v18 = vsel %vm266_vm2, %v2965_v17, 0.0 }
 0x83b   :  { %1552 = vadd.xlane.f32.xlu1 %v1551_v18  ;;  %v2300_v18 = vld [vmem:[%s3376_s2 + $0x8] sm:$0xff] }
 0x83d   :  { %v2967_v19 = vpop.eup %2966 }
 0x83e   :  { %v1554_v20 = vsel %vm266_vm2, %v2967_v19, 0.0 }
 0x83f   :  { %1555 = vadd.xlane.f32.xlu0 %v1554_v20  ;;  %v2301_v20 = vld [vmem:[%s3376_s2 + $0x10] sm:$0xff] }
 0x840   :  { %v2937_v22 = vpack.c.bf16 %v2302_v21, %v2301_v20 }
 0x8c8   :  { %v1553_v29 = vpop.xlane.xlu1 %1552 }
 0x8c9   :  { %2968 = vrcp.f32 %v1553_v29 }
 0x8cc   :  { %v1556_v30 = vpop.xlane.xlu0 %1555 }
 0x8cd   :  { %2970 = vrcp.f32 %v1556_v30 }
 0x8d3   :  { %v2969_v33 = vpop.eup %2968 }
 0x8d4   :  { %v1559_v34 = vmul.f32 %v2969_v33, %v2965_v17 }
 0x8d6   :  { %2766 = vmatmul.mubr.msk.f32.vlgmr.msra.gmra.mrb[14].mxu0 %vm266_vm2, %v1559_v34 }
 0x8d7   :  { %v2971_v38 = vpop.eup %2970  ;;  %2912 = vmatpush3.bf16.msra.mxu0 %v2909_v28  ;;  %2781 = vmatprep.mubr.msk.f32.mxu0 %vm24_vm0, %v3063_v11 }
 0x8d8   :  { %v1560_v39 = vmul.f32 %v2971_v38, %v2967_v19  ;;  %2914 = vmatprep.subr.bf16.mxu0 %v2913_v35 }
 0x8da   :  { %2771 = vmatmul.mubr.msk.f32.vlgmr.msra.gmra.mrb[24].mxu1 %vm266_vm2, %v1560_v39  ;;  %v2501_v39 = vld [vmem:[%s3377_s3] ss:$0 sm:$0xff] }
 0x8db   :  { %2920 = vmatpush3.bf16.msra.mxu1 %v2917_v25  ;;  %2792 = vmatprep.mubr.msk.f32.mxu1 %vm24_vm0, %v3063_v11 }
 0x8dc   :  { %2922 = vmatprep.subr.bf16.mxu1 %v2921_v40  ;;  %2916 = vmatpush3.bf16.msra.mxu0 %v2913_v35 }
 0x8df   :  { %2924 = vmatpush3.bf16.msra.mxu1 %v2921_v40  ;;  %2782 = vmatmul.mubr.msk.f32.vlgmr.msra.gmra.mrb[16].mxu0 %vm24_vm0, %v3072_v13 }
 0x8e0   :  { %2806 = vmatprep.subr.mxu1 %v3004_v14  ;;  %2803 = vmatprep.mubr.msk.f32.mxu0 %vm24_vm0, %v3063_v11  ;;  %v2489_v11 = vld [vmem:[%s3375_s1 + $0x160] sm:$0xff]  ;;  %s3006_s1 = smov 8  }
 0x8e1   :  { %v2925_v53 = vpack.c.bf16 %v2490_v49, %v2489_v11 }
 0x8e2   :  { %2793 = vmatmul.mubr.msk.f32.vlgmr.msra.gmra.mrb[26].mxu1 %vm24_vm0, %v3072_v13 }
 0x8e3   :  { %2808 = vmatprep.mubr.msk.f32.mxu1 %vm3005_vm1, %v3004_v14  ;;  %2926 = vmatprep.subr.bf16.mxu0 %v2925_v53 }
 0x8e4   :  { %2928 = vmatpush3.bf16.msra.mxu0 %v2925_v53 }
 0x8e5   :  { %2930 = vmatprep.subr.bf16.mxu0 %v2929_v55 }
 0x8e8   :  { %2932 = vmatpush3.bf16.msra.mxu0 %v2929_v55 }
 0x8e9   :  { %2816 = vmatprep.subr.mxu0 %v3004_v14 }
 0x8eb   :  { %2804 = vmatmul.mubr.msk.f32.vlgmr.msra.gmra.mrb[18].mxu0 %vm24_vm0, %v3072_v13 }
 0x8ec   :  { %2818 = vmatprep.mubr.msk.f32.mxu0 %vm3005_vm1, %v3004_v14 }
 0x9a9   :  { %v1630_v41 = vpop.f32.mrb[14].mxu0 }
 0x9aa   :  { %v2767_v42 = vpop.f32.mrb[15].mxu0 }
 0x9ad   :  { %v1703_v43 = vpop.f32.mrb[24].mxu1 }
 0x9ae   :  { %v2772_v44 = vpop.f32.mrb[25].mxu1 }
 0x9b2   :  { %v2783_v45 = vpop.f32.mrb[16].mxu0 }
 0x9b3   :  { %v1778_v46 = vpop.f32.mrb[17].mxu0 }
 0x9b5   :  { %v2794_v47 = vpop.f32.mrb[26].mxu1 }
 0x9b6   :  { %v1858_v48 = vpop.f32.mrb[27].mxu1 }
 0x9b7   :  { %2807 = vmatpush3.xpose.msk.msra.mxu1 %vm266_vm2, %v1858_v48 }
 0x9b8   :  { %2811 = vmatprep.subr.mxu1 %v3004_v14 }
 0x9ba   :  { %2809 = vmatmul.mubr.msk.f32.vlgmr.msra.gmra.mrb[28].mxu1 %vm266_vm2, %v1778_v46 }
 0x9bb   :  { %2812 = vmatpush3.xpose.msk.msra.mxu1 %vm266_vm2, %v2794_v47  ;;  %2813 = vmatprep.mubr.msk.f32.mxu1 %vm3005_vm1, %v3004_v14 }
 0x9bc   :  { %2821 = vmatprep.subr.mxu1 %v3004_v14 }
 0x9be   :  { %2814 = vmatmul.mubr.msk.f32.vlgmr.msra.gmra.mrb[30].mxu1 %vm266_vm2, %v2783_v45  ;;  %v2805_v8 = vpop.f32.mrb[18].mxu0 }
 0x9bf   :  { %2823 = vmatprep.mubr.msk.f32.mxu1 %vm3005_vm1, %v3004_v14  ;;  %v1938_v9 = vpop.f32.mrb[19].mxu0  ;;  %2822 = vmatpush3.msra.mxu1 %v2805_v8 }
 0x9c0   :  { %2817 = vmatpush3.msra.mxu0 %v1938_v9 }
 0xa8d   :  { %v2019_v56 = vpop.f32.mrb[28].mxu1 }
 0xa8e   :  { %v2810_v57 = vpop.f32.mrb[29].mxu1  ;;  %v2099_v58 = vsel %vm266_vm2, %v2019_v56, -inf }
 0xa8f   :  { %2100 = vmax.xlane.f32.xlu0 %v2099_v58 }
 0xa91   :  { %v2095_v59 = vpop.f32.mrb[30].mxu1 }
 0xa92   :  { %v2815_v60 = vpop.f32.mrb[31].mxu1  ;;  %v2102_v61 = vsel %vm266_vm2, %v2095_v59, -inf }
 0xa93   :  { %2103 = vmax.xlane.f32.xlu1 %v2102_v61 }
 0xb1c   :  { %v2101_v62 = vpop.xlane.xlu0 %2100 }
 0xb1d   :  { %v2105_v0 = vsub.f32 %v2019_v56, %v2101_v62 }
 0xb1f   :  { %v2107_v2 = vmul.f32 1.442695, %v2105_v0 }
 0xb20   :  { %v2104_v3 = vpop.xlane.xlu1 %2103 }
 0xb21   :  { %2972 = vpow2.f32 %v2107_v2  ;;  %v2106_v4 = vsub.f32 %v2095_v59, %v2104_v3 }
 0xb23   :  { %v2109_v13 = vmul.f32 1.442695, %v2106_v4 }
 0xb25   :  { %2974 = vpow2.f32 %v2109_v13 }
 0xb2b   :  { %v2973_v5 = vpop.eup %2972 }
 0xb2c   :  { %v2111_v14 = vsel %vm266_vm2, %v2973_v5, 0.0 }
 0xb2d   :  { %2112 = vadd.xlane.f32.xlu0 %v2111_v14 }
 0xb2f   :  { %v2975_v6 = vpop.eup %2974 }
 0xb30   :  { %v2114_v7 = vsel %vm266_vm2, %v2975_v6, 0.0 }
 0xb31   :  { %2115 = vadd.xlane.f32.xlu1 %v2114_v7 }
 0xb42   :  { %2271 = vrot.lane.b32.xlu1 %v3229_v52, %s3006_s1 }
 0xb43   :  { %2269 = vrot.lane.b32.xlu0 %v3227_v50, %s3006_s1  ;;  %v2299_v50 = vld [vmem:[%s3376_s2] sm:$0xff] }
 0xb44   :  { %v2933_v19 = vpack.c.bf16 %v2300_v18, %v2299_v50 }
 0xb46   :  { %2277 = vrot.lane.b32.xlu1 %v1630_v41, %s3007_s8  ;;  %2934 = vmatprep.subr.bf16.mxu0 %v2933_v19 }
 0xb4a   :  { %2279 = vrot.lane.b32.xlu1 %v1703_v43, %s3007_s8 }
 0xbba   :  { %v2113_v10 = vpop.xlane.xlu0 %2112 }
 0xbbb   :  { %2976 = vrcp.f32 %v2113_v10 }
 0xbbe   :  { %v2116_v12 = vpop.xlane.xlu1 %2115  ;;  %v2270_v29 = vpop.permute.xlu0 %2269 }
 0xbbf   :  { %2978 = vrcp.f32 %v2116_v12  ;;  %v2291_v30 = vsel %vm266_vm2, %v3153_v63, %v2270_v29 }
 0xbc2   :  { %v2272_v27 = vpop.permute.xlu1 %2271 }
 0xbc3   :  { %v2292_v35 = vsel %vm266_vm2, %v3155_v1, %v2272_v27 }
 0xbc5   :  { %v2977_v15 = vpop.eup %2976 }
 0xbc6   :  { %v2119_v16 = vmul.f32 %v2977_v15, %v2973_v5  ;;  %v2278_v28 = vpop.permute.xlu1 %2277 }
 0xbc7   :  { %v2294_v31 = vsel %vm2293_vm3, %v2291_v30, %v2278_v28 }
 0xbc8   :  { %2819 = vmatmul.mubr.msk.f32.vlgmr.msra.gmra.mrb[20].mxu0 %vm266_vm2, %v2119_v16 }
 0xbc9   :  { %v2979_v17 = vpop.eup %2978  ;;  %2936 = vmatpush3.bf16.msra.mxu0 %v2933_v19 }
 0xbca   :  { %v2120_v52 = vmul.f32 %v2979_v17, %v2975_v6  ;;  %2938 = vmatprep.subr.bf16.mxu0 %v2937_v22  ;;  %v2280_v32 = vpop.permute.xlu1 %2279 }
 0xbcb   :  { %v2295_v36 = vsel %vm2293_vm3, %v2292_v35, %v2280_v32 }
 0xbcc   :  { %2824 = vmatmul.mubr.msk.f32.vlgmr.msra.gmra.mrb[32].mxu1 %vm266_vm2, %v2120_v52 }
 0xbcd   :  { %2940 = vmatpush3.bf16.msra.mxu0 %v2937_v22 }
 0xc9b   :  { %v2190_v23 = vpop.f32.mrb[20].mxu0 }
 0xc9c   :  { %2285 = vrot.lane.b32.xlu0 %v2190_v23, %s3008_s16  ;;  %v2820_v24 = vpop.f32.mrb[21].mxu0 }
 0xc9f   :  { %v2263_v25 = vpop.f32.mrb[32].mxu1 }
 0xca0   :  { %2287 = vrot.lane.b32.xlu1 %v2263_v25, %s3008_s16  ;;  %v2825_v26 = vpop.f32.mrb[33].mxu1 }
 0xd0e   :  { %v2286_v33 = vpop.permute.xlu0 %2285 }
 0xd0f   :  { %v2297_v34 = vsel %vm2296_vm4, %v2294_v31, %v2286_v33 }
 0xd10   :  { %2834 = vmatprep.mubr.msk.f32.mxu0 %vm24_vm0, %v2297_v34 }
 0xd12   :  { %v2288_v37 = vpop.permute.xlu1 %2287 }
 0xd13   :  { %v2298_v38 = vsel %vm2296_vm4, %v2295_v36, %v2288_v37 }
 0xd14   :  { %2835 = vmatmul.mubr.msk.f32.vlgmr.msra.gmra.mrb[22].mxu0 %vm24_vm0, %v2298_v38 }
 0xde7   :  { %v2836_v63 = vpop.f32.mrb[22].mxu0 }
 0xde8   :  { %v2388_v40 = vadd.f32 %v2836_v63, %v2501_v39  ;;  %v2382_v41 = vpop.f32.mrb[23].mxu0 }
 0xde9   :  { %v2383_v42 = vadd.f32 %v2501_v39, %v2382_v41 }
 0xdea   :  { %2392 = vst.msk [vmem:[#allocation2 + $0x8] sm:$0xff] %vm24_vm0, %v2388_v40 }
 0xdeb   :  { %2391 = vst.msk [vmem:[#allocation2] sm:$0xff] %vm24_vm0, %v2383_v42 }
 0xdec   :  { %2991 = shalt.err (!%p2988_p4)
}
 0xded   :  { %s2992_s22 = scalar_lea.hbm %s3378_s4, 256 }
 0xdee   :  { %p2993_p5 = scmp.ne.s32.totalorder %s3378_s4, %s2992_s22  ;;  %p2996_p6 = scmp.lt.u32.totalorder %s2992_s22, %s3378_s4 }
 0xdf0   :  { %p2998_p7 = pnand %p2996_p6, %p2993_p5 }
 0xdf2   :  { %3001 = shalt.err (!%p2998_p7)
}
 0xdf3   :  { %s3010_s27 = smov 128  }
 0xdf4   :  { %2404 = dma.vmem_to_hbm [thread:$0]  %s2399_s19, 256, %s3378_s4, [#allocation3], %s3010_s27, %s3010_s27, %s3006_s1  }
 0xdf5   :  { %3002 = dma.done.wait [#allocation3], 256  }
 0xdf6   :  { %3003 = vsyncadd [#allocation3], 4294967040 }
 0xdf7   :  { %2408 = vsyncpa [#allocation3], 1 }

</bundles_post_ra>
